<compile_context>
chip_gen: v5e
topology: v5e:2x2
jax: 0.10.0
libtpu: 0.0.40
codegen_flags: <defaults>
</compile_context>

<pallas_src>
import math

import jax
import jax.numpy as jnp
from jax.experimental import pallas as pl
from jax.experimental.pallas import tpu as pltpu

# ---------------- small deterministic config (mirrors configs.*) -------------
B = 2            # batch
L = 16           # seq_len
N = 8            # num_nodes
F = 2            # trailing feature dim of the raw input (forward keeps [..., 0])
P = 4            # pred_len
LAYER_NUMS = 2   # configs.layer_nums
REVIN_EPS = 1e-5
STD_EPS = 1e-6

# Packed-parameter layout (one [16, L+1] f32 buffer):
#   rows 0:P      , cols 0:L   -> w1   [P, L]
#   rows 0:P      , col  L     -> b1   [P]
#   rows 8:8+2P   , cols 0:P   -> w2c  [2P, P]   (row block starts at 8 so the
#   rows 8:8+2P   , col  L     -> b2c  [2P]       slice is sublane-tile aligned)
W2_ROW = 8
PARAM_ROWS = W2_ROW + 2 * P      # 16
PARAM_COLS = L + 1               # 17


# ----------------------------- fused Pallas kernel ----------------------------
def fused_forward_kernel(x_ref, p_ref, o_ref):
    """x:[L, B*N]  p:[16, L+1] packed params  ->  o:[2P, B*N]."""
    x = x_ref[...]                                              # [L, BN]

    # ---- RevIN 'norm' (affine=False, population variance over time) ----
    mu = jnp.mean(x, axis=0, keepdims=True)                     # [1, BN]
    var = jnp.mean((x - mu) ** 2, axis=0, keepdims=True)        # [1, BN]
    xn = (x - mu) * jax.lax.rsqrt(var + REVIN_EPS)              # [L, BN]

    # ---- static views into the single packed parameter buffer ----
    w1 = p_ref[0:P, 0:L]                                        # [P, L]
    b1 = p_ref[0:P, L:L + 1]                                    # [P, 1]
    w2 = p_ref[W2_ROW:W2_ROW + 2 * P, 0:P]                      # [2P, P]
    b2 = p_ref[W2_ROW:W2_ROW + 2 * P, L:L + 1]                  # [2P, 1]

    # ---- Linear(L,P) + tanh, contracting over time (single dot, all batches) --
    h = jnp.tanh(
        jnp.dot(w1, xn, preferred_element_type=jnp.float32) + b1)      # [P, BN]

    # ---- merged Linear(P, 2P) head: rows [0,P)=mean, rows [P,2P)=std ----
    y = jnp.dot(w2, h, preferred_element_type=jnp.float32) + b2        # [2P, BN]

    # mean rows stored as-is; softplus (stable logaddexp) + eps on the std rows only
    o_ref[0:P, :] = y[0:P, :]
    o_ref[P:2 * P, :] = jnp.logaddexp(y[P:2 * P, :], 0.0) + STD_EPS


def fused_forward(x_bln, packed_params):
    """x_bln: [B, L, N]; packed_params: [16, L+1] -> (mean [B,P,N], std [B,P,N])."""
    b, l, n = x_bln.shape
    # fold batch onto the lane axis: [B, L, N] -> [L, B*N] (tiny XLA reshuffle)
    x_lbn = jnp.transpose(x_bln, (1, 0, 2)).reshape(l, b * n).astype(jnp.float32)

    vmem = pl.BlockSpec(memory_space=pltpu.MemorySpace.VMEM)
    out = pl.pallas_call(
        fused_forward_kernel,
        out_shape=jax.ShapeDtypeStruct((2 * P, b * n), jnp.float32),
        in_specs=[vmem, vmem],
        out_specs=vmem,
    )(x_lbn, packed_params)

    out_b = out.reshape(2 * P, b, n).transpose(1, 0, 2)          # [B, 2P, N]
    mean = out_b[:, :P, :]                                       # [B, P, N]
    std = out_b[:, P:, :]                                        # [B, P, N]
    return mean, std


# ----------------------- one-time parameter preprocessing ---------------------
def prepare_params(params):
    """De-interleave the Linear(P, 2P) head and pack all params into one buffer.

    The PyTorch reference does `projections(out).reshape(B, N, P, 2)`, i.e.
    output channel 2k is the mean head for pred step k and channel 2k+1 is the
    std head for pred step k.  We stack [mean rows; std rows] so the kernel
    needs a single [2P, P] dot.
    """
    w1 = params["w1"].astype(jnp.float32)                        # [P, L]
    b1 = params["b1"].astype(jnp.float32)                        # [P]
    w2 = params["w2"].astype(jnp.float32)                        # [2P, P] interleaved
    b2 = params["b2"].astype(jnp.float32)                        # [2P]
    w2c = jnp.concatenate([w2[0::2, :], w2[1::2, :]], axis=0)    # [2P, P]
    b2c = jnp.concatenate([b2[0::2], b2[1::2]])                  # [2P]

    buf = jnp.zeros((PARAM_ROWS, PARAM_COLS), jnp.float32)
    buf = buf.at[0:P, 0:L].set(w1)
    buf = buf.at[0:P, L].set(b1)
    buf = buf.at[W2_ROW:W2_ROW + 2 * P, 0:P].set(w2c)
    buf = buf.at[W2_ROW:W2_ROW + 2 * P, L].set(b2c)
    return buf


# ------------------------------ model forward ---------------------------------
def model_forward(x, packed_params):
    """x: [B, L, N, F]  (PyTorch: [batch, seq_len, num_nodes, features])."""
    x3 = x[:, :, :, 0].astype(jnp.float32)     # feature-0 select (tiny XLA slice)

    balance_loss = jnp.float32(0.0)
    for _ in range(LAYER_NUMS):
        # TODO(synk): AMS (adaptive MoE / cross-GNN block) class is not provided
        # in the reference source; treated as identity with zero aux loss.
        balance_loss = balance_loss + jnp.float32(0.0)

    mean, std = fused_forward(x3, packed_params)                 # [B, P, N] each
    # TODO(synk): reference applies revin_layer(out, 'denorm') after mean/std
    # are extracted; its result never reaches the returned values, so omitted.
    return mean, balance_loss, std


# ----------------------------- pure-JAX reference -----------------------------
def reference_forward(x, params):
    x3 = x[:, :, :, 0].astype(jnp.float32)
    mu = jnp.mean(x3, axis=1, keepdims=True)
    var = jnp.mean((x3 - mu) ** 2, axis=1, keepdims=True)
    xn = (x3 - mu) / jnp.sqrt(var + REVIN_EPS)
    out = jnp.transpose(xn, (0, 2, 1))                                # [B, N, L]
    h = jnp.tanh(out @ params["w1"].T + params["b1"])                 # [B, N, P]
    y = h @ params["w2"].T + params["b2"]                             # [B, N, 2P]
    y = y.reshape(B, N, P, 2)
    y = jnp.transpose(y, (0, 2, 1, 3))                                # [B, P, N, 2]
    mean = y[..., 0]
    std = jax.nn.softplus(y[..., 1]) + STD_EPS
    return mean, jnp.float32(0.0), std


# ---------------------------------- main ---------------------------------------
def init_params(key):
    k1, k2, k3, k4 = jax.random.split(key, 4)
    bnd1 = 1.0 / math.sqrt(L)
    bnd2 = 1.0 / math.sqrt(P)
    return {
        "w1": jax.random.uniform(k1, (P, L), jnp.float32, -bnd1, bnd1),
        "b1": jax.random.uniform(k2, (P,), jnp.float32, -bnd1, bnd1),
        "w2": jax.random.uniform(k3, (2 * P, P), jnp.float32, -bnd2, bnd2),
        "b2": jax.random.uniform(k4, (2 * P,), jnp.float32, -bnd2, bnd2),
    }


if __name__ == "__main__":
    key = jax.random.PRNGKey(0)
    kp, kx = jax.random.split(key)
    params = init_params(kp)
    packed_params = jax.block_until_ready(prepare_params(params))  # one-time prep
    x = jax.random.normal(kx, (B, L, N, F), dtype=jnp.float32)

    mean, balance_loss, std = jax.jit(model_forward)(x, packed_params)
    jax.block_until_ready((mean, balance_loss, std))

    mean_ref, _, std_ref = reference_forward(x, params)
    assert mean.shape == (B, P, N) and std.shape == (B, P, N)
    assert jnp.allclose(mean, mean_ref, rtol=1e-3, atol=1e-3)
    assert jnp.allclose(std, std_ref, rtol=1e-3, atol=1e-3)
    assert bool(jnp.all(std > 0.0))

    print("KERNEL_OK")
</pallas_src>

<mosaic_0001>
module attributes {stable_mosaic.version = 11 : i64} {
  func.func @fused_forward_kernel(%arg0: memref<16x16xf32, #tpu.memory_space<vmem>>, %arg1: memref<16x17xf32, #tpu.memory_space<vmem>>, %arg2: memref<8x16xf32, #tpu.memory_space<vmem>>) attributes {dimension_semantics = [], scalar_prefetch = 0 : i64, scratch_operands = 0 : i64, tpu.core_type = #tpu.core_type<tc>} {
    %c0 = arith.constant 0 : index
    %c0_0 = arith.constant 0 : index
    %0 = vector.load %arg0[%c0, %c0_0] : memref<16x16xf32, #tpu.memory_space<vmem>>, vector<16x16xf32>
    %cst = arith.constant dense<0.000000e+00> : vector<16xf32>
    %1 = vector.multi_reduction <add>, %0, %cst [0] : vector<16x16xf32> to vector<16xf32>
    %2 = vector.shape_cast %1 : vector<16xf32> to vector<1x16xf32>
    %cst_1 = arith.constant 1.600000e+01 : f32
    %3 = vector.broadcast %cst_1 : f32 to vector<1x16xf32>
    %4 = arith.divf %2, %3 : vector<1x16xf32>
    %5 = vector.broadcast %4 : vector<1x16xf32> to vector<16x16xf32>
    %6 = arith.subf %0, %5 : vector<16x16xf32>
    %7 = arith.mulf %6, %6 : vector<16x16xf32>
    %cst_2 = arith.constant dense<0.000000e+00> : vector<16xf32>
    %8 = vector.multi_reduction <add>, %7, %cst_2 [0] : vector<16x16xf32> to vector<16xf32>
    %9 = vector.shape_cast %8 : vector<16xf32> to vector<1x16xf32>
    %cst_3 = arith.constant 1.600000e+01 : f32
    %10 = vector.broadcast %cst_3 : f32 to vector<1x16xf32>
    %11 = arith.divf %9, %10 : vector<1x16xf32>
    %12 = vector.broadcast %4 : vector<1x16xf32> to vector<16x16xf32>
    %13 = arith.subf %0, %12 : vector<16x16xf32>
    %cst_4 = arith.constant 9.99999974E-6 : f32
    %14 = vector.broadcast %cst_4 : f32 to vector<1x16xf32>
    %15 = arith.addf %11, %14 : vector<1x16xf32>
    %16 = math.rsqrt %15 : vector<1x16xf32>
    %17 = vector.broadcast %16 : vector<1x16xf32> to vector<16x16xf32>
    %18 = arith.mulf %13, %17 : vector<16x16xf32>
    %c0_5 = arith.constant 0 : index
    %c0_6 = arith.constant 0 : index
    %19 = vector.load %arg1[%c0_5, %c0_6] : memref<16x17xf32, #tpu.memory_space<vmem>>, vector<4x16xf32>
    %c0_7 = arith.constant 0 : index
    %c16 = arith.constant 16 : index
    %20 = vector.load %arg1[%c0_7, %c16] : memref<16x17xf32, #tpu.memory_space<vmem>>, vector<4x1xf32>
    %c8 = arith.constant 8 : index
    %c0_8 = arith.constant 0 : index
    %21 = vector.load %arg1[%c8, %c0_8] : memref<16x17xf32, #tpu.memory_space<vmem>>, vector<8x4xf32>
    %c8_9 = arith.constant 8 : index
    %c16_10 = arith.constant 16 : index
    %22 = vector.load %arg1[%c8_9, %c16_10] : memref<16x17xf32, #tpu.memory_space<vmem>>, vector<8x1xf32>
    %cst_11 = arith.constant dense<0.000000e+00> : vector<4x16xf32>
    %23 = tpu.matmul %19, %18, %cst_11 {dimension_numbers = #tpu.dot_dimension_numbers<[1], [0], [0], [1], [0, 0, 1, 1], [], []>} : vector<4x16xf32>, vector<16x16xf32>, vector<4x16xf32> -> vector<4x16xf32>
    %24 = vector.broadcast %20 : vector<4x1xf32> to vector<4x16xf32>
    %25 = arith.addf %23, %24 : vector<4x16xf32>
    %26 = math.tanh %25 : vector<4x16xf32>
    %cst_12 = arith.constant dense<0.000000e+00> : vector<8x16xf32>
    %27 = tpu.matmul %21, %26, %cst_12 {dimension_numbers = #tpu.dot_dimension_numbers<[1], [0], [0], [1], [0, 0, 1, 1], [], []>} : vector<8x4xf32>, vector<4x16xf32>, vector<8x16xf32> -> vector<8x16xf32>
    %28 = vector.broadcast %22 : vector<8x1xf32> to vector<8x16xf32>
    %29 = arith.addf %27, %28 : vector<8x16xf32>
    %30 = vector.extract_strided_slice %29 {offsets = [0, 0], sizes = [4, 16], strides = [1, 1]} : vector<8x16xf32> to vector<4x16xf32>
    %c0_13 = arith.constant 0 : index
    %c0_14 = arith.constant 0 : index
    %31 = vector.load %arg2[%c0_13, %c0_14] : memref<8x16xf32, #tpu.memory_space<vmem>>, vector<4x16xf32>
    tpu.vector_store %arg2[%c0_13, %c0_14], %30 {strides = array<i32>} : memref<8x16xf32, #tpu.memory_space<vmem>>, vector<4x16xf32>,
    %32 = vector.extract_strided_slice %29 {offsets = [4, 0], sizes = [4, 16], strides = [1, 1]} : vector<8x16xf32> to vector<4x16xf32>
    %cst_15 = arith.constant 0.000000e+00 : f32
    %33 = vector.broadcast %cst_15 : f32 to vector<4x16xf32>
    %34 = arith.maximumf %32, %33 : vector<4x16xf32>
    %35 = vector.broadcast %cst_15 : f32 to vector<4x16xf32>
    %36 = arith.subf %32, %35 : vector<4x16xf32>
    %37 = arith.cmpf one, %36, %36 : vector<4x16xf32>
    %38 = vector.broadcast %cst_15 : f32 to vector<4x16xf32>
    %39 = arith.addf %32, %38 : vector<4x16xf32>
    %40 = math.absf %36 : vector<4x16xf32>
    %cst_16 = arith.constant 0.000000e+00 : f32
    %41 = vector.broadcast %cst_16 : f32 to vector<4x16xf32>
    %42 = arith.subf %41, %40 : vector<4x16xf32>
    %43 = math.exp %42 : vector<4x16xf32>
    %44 = math.log1p %43 : vector<4x16xf32>
    %45 = arith.addf %34, %44 : vector<4x16xf32>
    %46 = arith.select %37, %39, %45 : vector<4x16xi1>, vector<4x16xf32>
    %cst_17 = arith.constant 9.99999997E-7 : f32
    %47 = vector.broadcast %cst_17 : f32 to vector<4x16xf32>
    %48 = arith.addf %46, %47 : vector<4x16xf32>
    %c4 = arith.constant 4 : index
    %c0_18 = arith.constant 0 : index
    %49 = vector.load %arg2[%c4, %c0_18] : memref<8x16xf32, #tpu.memory_space<vmem>>, vector<4x16xf32>
    tpu.vector_store %arg2[%c4, %c0_18], %48 {strides = array<i32>} : memref<8x16xf32, #tpu.memory_space<vmem>>, vector<4x16xf32>,
    return
  }
}

</mosaic_0001>

<bundles_post_ra>
// kernel: model_forward.1
= control target key start
LH: loop header
LB: loop body
LE: loop exit
PB: predicated region body
PF: predicated region fallthrough
CT: control target
= control target key end

     0   :  { %vm13_vm0 = vcmask 130048   ;;  %v163_v2 = vmov 16.0   ;;  %v164_v32 = vmov 16   ;;  %vm96_vm5 = vcmask 1043456   ;;  %s203_s0 = inlined_call_operand.vmem [shape: f32[16,16], index: 0, kind: input, shape index: {}]   ;;  %s204_s1 = inlined_call_operand.vmem [shape: f32[16,17], index: 1, kind: input, shape index: {}]   ;;  %s205_s2 = inlined_call_operand.vmem [shape: f32[8,16], index: 2, kind: output, shape index: {}]  }
   0x1   :  { %v11_v0 = vld [vmem:[%s203_s0] sm:$0xff]  ;;  %v12_v1 = vld [vmem:[%s203_s0 + $0x8] sm:$0xff]  ;;  %153 = vrcp.f32 %v163_v2  ;;  %152 = vset.pattern.permute.xlu0 %v164_v32  ;;  %vm93_vm6 = vcmask 31744   ;;  %vm120_vm7 = vcmask 125952   ;;  %vm141_vm10 = vcmask 130052  }
   0x2   :  { %v14_v3 = vsel %vm13_vm0, %v11_v0, 0.0  ;;  %v15_v4 = vsel %vm13_vm0, %v12_v1, 0.0  ;;  %v58_v31 = vld [vmem:[%s204_s1] sm:$0xf]  ;;  %v59_v36 = vld [vmem:[%s204_s1 + $0x8] sm:$0xff] }
   0x3   :  { %v16_v5 = vadd.f32 %v15_v4, %v14_v3  ;;  %62 = vperm.xlu0 %152, %v58_v31  }
   0x5   :  { %v17_v6 = vrot.slane %v16_v5, 4 }
   0x7   :  { %v154_v7 = vpop.eup %153  ;;  %v18_v8 = vadd.f32 %v17_v6, %v16_v5 }
   0x8   :  { %v24_v9 = vmul.f32 16.0, %v154_v7  ;;  %vm28_vm1 = vweird.f32 %v154_v7 }
   0x9   :  { %v19_v10 = vrot.slane %v18_v8, 2 }
   0xa   :  { %v25_v11 = vsub.f32 1.0, %v24_v9 }
   0xb   :  { %v20_v12 = vadd.f32 %v19_v10, %v18_v8  ;;  %90 = vperm.xlu0 %152, %v59_v36  }
   0xc   :  { %v26_v13 = vmul.f32 %v154_v7, %v25_v11 }
   0xd   :  { %v21_v14 = vrot.slane %v20_v12, 1 }
   0xe   :  { %v27_v15 = vadd.f32 %v154_v7, %v26_v13 }
   0xf   :  { %v22_v16 = vadd.f32 %v21_v14, %v20_v12 }
  0x10   :  { %v29_v17 = vsel %vm28_vm1, %v154_v7, %v27_v15 }
  0x11   :  { %v30_v18 = vmul.f32 %v29_v17, %v22_v16 }
  0x13   :  { %v31_v19 = vsub.f32 %v11_v0, %v30_v18  ;;  %v32_v20 = vsub.f32 %v12_v1, %v30_v18 }
  0x15   :  { %v33_v21 = vmul.f32 %v31_v19, %v31_v19  ;;  %v34_v22 = vmul.f32 %v32_v20, %v32_v20 }
  0x17   :  { %v35_v23 = vsel %vm13_vm0, %v33_v21, 0.0  ;;  %v36_v24 = vsel %vm13_vm0, %v34_v22, 0.0 }
  0x18   :  { %v37_v25 = vadd.f32 %v36_v24, %v35_v23 }
  0x1a   :  { %v38_v26 = vrot.slane %v37_v25, 4 }
  0x1c   :  { %v39_v27 = vadd.f32 %v38_v26, %v37_v25 }
  0x1e   :  { %v40_v28 = vrot.slane %v39_v27, 2 }
  0x20   :  { %v41_v29 = vadd.f32 %v40_v28, %v39_v27 }
  0x22   :  { %v42_v30 = vrot.slane %v41_v29, 1 }
  0x24   :  { %v43_v33 = vadd.f32 %v42_v30, %v41_v29 }
  0x26   :  { %v44_v34 = vmul.f32 %v43_v33, %v29_v17 }
  0x28   :  { %v45_v35 = vadd.f32 1e-05, %v44_v34 }
  0x2a   :  { %155 = vrsqrt.f32 %v45_v35  ;;  %vm52_vm2 = vweird.f32 %v45_v35 }
  0x30   :  { %v156_v37 = vpop.eup %155 }
  0x31   :  { %v47_v38 = vmul.f32 %v156_v37, %v45_v35  ;;  %vm53_vm3 = vweird.f32 %v156_v37 }
  0x32   :  { %vm54_vm4 = vmor %vm52_vm2, %vm53_vm3 }
  0x33   :  { %v48_v39 = vmul.f32 %v156_v37, %v47_v38 }
  0x35   :  { %v49_v40 = vmul.f32 0.5, %v48_v39 }
  0x37   :  { %v50_v41 = vsub.f32 1.5, %v49_v40 }
  0x39   :  { %v51_v42 = vmul.f32 %v156_v37, %v50_v41 }
  0x3b   :  { %v55_v43 = vsel %vm54_vm4, %v156_v37, %v51_v42 }
  0x3c   :  { %v57_v44 = vmul.f32 %v55_v43, %v32_v20  ;;  %v56_v45 = vmul.f32 %v55_v43, %v31_v19 }
  0x3e   :  { %81 = vmatpush.msra.mxu0 %v57_v44 }
  0x40   :  { %82 = vmatpush.msra.mxu0 %v56_v45 }
  0x41   :  { %147 = vmatmul.msk.f32.vlgmr.msra.gmra.mxu0 %vm13_vm0, %v58_v31 }
  0x75   :  { %v63_v46 = vpop.permute.xlu0 %62 }
  0x7d   :  { %v91_v50 = vpop.permute.xlu0 %90 }
  0xbe   :  { %v84_v47 = vpop.f32.mrf.mxu0 }
  0xbf   :  { %v85_v48 = vadd.f32 %v84_v47, %v63_v46 }
  0xc1   :  { %157 = vtanh.f32 %v85_v48 }
  0xc7   :  { %v158_v49 = vpop.eup %157 }
  0xc8   :  { %148 = vmatpush.msk.msra.mxu1 %vm96_vm5, %v158_v49 }
  0xc9   :  { %149 = vmatmul.msk.f32.vlgmr.msra.gmra.mxu1 %vm93_vm6, %v59_v36 }
 0x146   :  { %v117_v51 = vpop.f32.mrf.mxu1 }
 0x147   :  { %v118_v52 = vadd.f32 %v117_v51, %v91_v50 }
 0x149   :  { %121 = vst.msk [vmem:[%s205_s2] sm:$0xf] %vm120_vm7, %v118_v52  ;;  %v125_v53 = vand.u32 2147483647, %v118_v52  ;;  %v122_v0 = vmax.f32 %v118_v52, 0.0  ;;  %vm123_vm9 = vcmp.ne.f32.partialorder %v118_v52, %v118_v52 }
 0x14b   :  { %v126_v54 = vsub.f32 0.0, %v125_v53 }
 0x14d   :  { %v127_v55 = vmul.f32 1.442695, %v126_v54 }
 0x14f   :  { %159 = vpow2.f32 %v127_v55 }
 0x155   :  { %v160_v56 = vpop.eup %159 }
 0x156   :  { %v129_v57 = vadd.f32 1.0, %v160_v56  ;;  %v132_v58 = vmul.f32 -0.5, %v160_v56  ;;  %v135_v60 = vand.u32 2147483647, %v160_v56 }
 0x158   :  { %161 = vlog2.f32 %v129_v57  ;;  %v133_v59 = vadd.f32 1.0, %v132_v58  ;;  %vm136_vm8 = vcmp.lt.f32.partialorder %v135_v60, 0.0004427343 }
 0x15a   :  { %v134_v63 = vmul.f32 %v160_v56, %v133_v59 }
 0x15e   :  { %v162_v61 = vpop.eup %161 }
 0x15f   :  { %v131_v62 = vmul.f32 0.6931472, %v162_v61 }
 0x161   :  { %v137_v1 = vsel %vm136_vm8, %v134_v63, %v131_v62 }
 0x162   :  { %v138_v2 = vadd.f32 %v137_v1, %v122_v0 }
 0x164   :  { %v139_v3 = vsel %vm123_vm9, %v118_v52, %v138_v2 }
 0x165   :  { %v140_v4 = vadd.f32 1e-06, %v139_v3 }
 0x167   :  { %142 = vst.msk [vmem:[%s205_s2] sm:$0xf0] %vm141_vm10, %v140_v4 }

</bundles_post_ra>
